<compile_context>
chip_gen: v7x
topology: tpu7x:2x2x1
jax: 0.10.0
libtpu: 0.0.40
codegen_flags: <defaults>
</compile_context>

<pallas_src>
import jax
import jax.numpy as jnp
from jax import lax
from jax.experimental import pallas as pl
from jax.experimental.pallas import tpu as pltpu

LANES = 128
SUBLANES = 8
ACC_ROWS = 64                    # accumulator height -> 8 independent vreg add chains
ROW_ALIGN = 64                   # multiple of min sublane tile for f32/bf16/int8/fp8
MAX_TILE_ROWS = 16384
INPUT_BUF_BYTES = 16 * 1024 * 1024   # budget for double-buffered x+y input blocks
VMEM_LIMIT_BYTES = 32 * 1024 * 1024  # safe on v5e/v6e/v7x (raises v5e's 16 MiB default)


def _tensorcores_per_device() -> int:
    """2 for multi-TensorCore devices (v4/v5p megacore, v7x), else 1."""
    try:
        dev = jax.devices()[0]
        if dev.platform != "tpu":
            return 1
        kind = dev.device_kind.lower()
    except Exception:
        return 1
    if "lite" in kind or "v5e" in kind or "v6e" in kind:
        return 1          # v5e / v6e: single TensorCore per chip
    if "v2" in kind or "v3" in kind:
        return 1          # v2/v3 expose one core per device
    return 2              # v4 / v5p megacore, v7x


def _make_mse_kernel(tm: int, inner_steps: int, rows: int, x_dtype,
                     n_chunks: int, unroll: int):
    """Kernel producing per-core (8, 128) partial sums of (x - y)^2."""

    def kernel(x_ref, y_ref, o_ref, acc_ref):
        c = pl.program_id(0)
        i = pl.program_id(1)
        blk = c * inner_steps + i            # un-clamped logical block index
        start_row = blk * tm

        @pl.when(i == 0)
        def _init():
            acc_ref[...] = jnp.zeros_like(acc_ref)

        zero = jnp.zeros((ACC_ROWS, LANES), jnp.float32)

        def run_block(masked: bool):
            # Hoisted outside the loop so it is built once (no per-iter broadcast).
            row_iota = (lax.broadcasted_iota(jnp.int32, (ACC_ROWS, LANES), 0)
                        if masked else None)

            def body(j, acc):
                r0 = pl.multiple_of(j * ACC_ROWS, ACC_ROWS)
                xs = x_ref[pl.ds(r0, ACC_ROWS), :].astype(jnp.float32)
                # Match torch: y.to(x.dtype) first, then accumulate in f32.
                ys = y_ref[pl.ds(r0, ACC_ROWS), :].astype(x_dtype).astype(jnp.float32)
                d = xs - ys
                sq = d * d
                if masked:
                    rid = row_iota + (start_row + r0)
                    sq = jnp.where(rid < rows, sq, 0.0)
                return acc + sq

            block_acc = lax.fori_loop(0, n_chunks, body, zero, unroll=unroll)
            acc_ref[...] += block_acc

        @pl.when(start_row + tm <= rows)      # fully in-bounds block (hot path)
        def _full():
            run_block(False)

        @pl.when(start_row + tm > rows)       # ragged-tail / overshoot block
        def _tail():
            run_block(True)

        @pl.when(i == pl.num_programs(1) - 1)
        def _finalize():
            # Fold the (64, 128) accumulator down to one (8, 128) tile.
            total = acc_ref[0:SUBLANES, :]
            for k in range(1, ACC_ROWS // SUBLANES):
                total = total + acc_ref[k * SUBLANES:(k + 1) * SUBLANES, :]
            o_ref[...] = total

    return kernel


def l2_loss(x: jax.Array, y: jax.Array) -> jax.Array:
    """Pallas implementation of F.mse_loss(x, y.to(x.dtype).view_as(x))."""
    assert x.size == y.size, "view_as requires matching element counts"
    total_n = x.size
    x_dtype = x.dtype

    x_flat = x.reshape(-1)
    y_flat = y.reshape(-1)

    rows = total_n // LANES              # full 128-wide rows handled by the kernel
    rem = total_n - rows * LANES         # <128 trailing elements handled in jnp

    if rows < ACC_ROWS:
        # Tiny input (< ~8K elements): kernel dispatch overhead dominates; also
        # guarantees every Pallas block fits inside the logical array below.
        xf = x_flat.astype(jnp.float32)
        yf = y_flat.astype(x_dtype).astype(jnp.float32)
        d = xf - yf
        return (jnp.sum(d * d) / jnp.float32(total_n)).astype(x_dtype)

    num_cores = _tensorcores_per_device()

    x_bytes = jnp.dtype(x.dtype).itemsize
    y_bytes = jnp.dtype(y.dtype).itemsize

    # VMEM-budget-driven tile height (2 = double buffering of each input block).
    per_row = 2 * LANES * (x_bytes + y_bytes)
    tm_budget = max(ROW_ALIGN, (INPUT_BUF_BYTES // per_row // ROW_ALIGN) * ROW_ALIGN)
    # Never exceed each core's share of the data (rounded DOWN so block <= array).
    tm_data = max(ROW_ALIGN, (pl.cdiv(rows, num_cores) // ROW_ALIGN) * ROW_ALIGN)
    tm = min(tm_budget, tm_data, MAX_TILE_ROWS)

    total_blocks = pl.cdiv(rows, tm)
    num_cores = min(num_cores, total_blocks)
    inner_steps = pl.cdiv(total_blocks, num_cores)

    n_chunks = tm // ACC_ROWS
    unroll = max(1, min(8, n_chunks))

    # Lane-aligned prefix as a (rows, 128) slab.  When total_n % 128 == 0 this is
    # a pure bitcast (no HBM copy); otherwise XLA materializes the prefix once
    # and the <128-element tail is summed in plain jnp below.
    n_main = rows * LANES
    x2 = x_flat[:n_main].reshape(rows, LANES)
    y2 = y_flat[:n_main].reshape(rows, LANES)

    kernel = _make_mse_kernel(tm, inner_steps, rows, x_dtype, n_chunks, unroll)

    def idx_map(c, i):
        # Clamp so the DMA window of any overshoot iteration stays in bounds;
        # the kernel masks its contribution to zero via the un-clamped index.
        return (jnp.minimum(c * inner_steps + i, total_blocks - 1), 0)

    bytes_accessed = n_main * (x_bytes + y_bytes) + num_cores * SUBLANES * LANES * 4

    partials = pl.pallas_call(
        kernel,
        out_shape=jax.ShapeDtypeStruct((num_cores * SUBLANES, LANES), jnp.float32),
        grid_spec=pltpu.PrefetchScalarGridSpec(
            num_scalar_prefetch=0,
            grid=(num_cores, inner_steps),
            in_specs=[
                pl.BlockSpec((tm, LANES), idx_map),
                pl.BlockSpec((tm, LANES), idx_map),
            ],
            out_specs=pl.BlockSpec((SUBLANES, LANES), lambda c, i: (c, 0)),
            scratch_shapes=[pltpu.VMEM((ACC_ROWS, LANES), jnp.float32)],
        ),
        compiler_params=pltpu.CompilerParams(
            dimension_semantics=("parallel", "arbitrary"),
            vmem_limit_bytes=VMEM_LIMIT_BYTES,
        ),
        cost_estimate=pl.CostEstimate(
            flops=3 * total_n, transcendentals=0, bytes_accessed=bytes_accessed),
    )(x2, y2)

    total = jnp.sum(partials, dtype=jnp.float32)
    if rem:
        xt = x_flat[n_main:].astype(jnp.float32)
        yt = y_flat[n_main:].astype(x_dtype).astype(jnp.float32)
        dt = xt - yt
        total = total + jnp.sum(dt * dt)
    return (total / jnp.float32(total_n)).astype(x_dtype)


if __name__ == "__main__":
    key = jax.random.PRNGKey(0)
    kx, ky, kx2, ky2, kx3, ky3 = jax.random.split(key, 6)

    loss_fn = jax.jit(l2_loss)

    # NCHW conv-style input: (N=2, C=4, H=64, W=64).
    x = jax.random.normal(kx, (2, 4, 64, 64), dtype=jnp.float32)
    # y arrives in a different dtype / flattened shape to exercise the
    # `.to(x.dtype).view_as(x)` glue.
    y = jax.random.normal(ky, (2, 4 * 64 * 64), dtype=jnp.bfloat16)

    loss = jax.block_until_ready(loss_fn(x, y))
    ref = jnp.mean((x - y.astype(x.dtype).reshape(x.shape)) ** 2)
    assert jnp.allclose(loss, ref, rtol=1e-5, atol=1e-6), (loss, ref)

    # Ragged shape (element count not a multiple of 128) exercises the in-kernel
    # row mask and the <128-element lane tail.
    xr = jax.random.normal(kx2, (2, 4, 33, 33), dtype=jnp.float32)
    yr = jax.random.normal(ky2, (2, 4 * 33 * 33), dtype=jnp.bfloat16)
    loss_r = jax.block_until_ready(jax.jit(l2_loss)(xr, yr))
    ref_r = jnp.mean((xr - yr.astype(xr.dtype).reshape(xr.shape)) ** 2)
    assert jnp.allclose(loss_r, ref_r, rtol=1e-5, atol=1e-6), (loss_r, ref_r)

    # Tiny input exercises the pure-jnp fast path.
    xt = jax.random.normal(kx3, (2, 4, 4, 4), dtype=jnp.float32)
    yt = jax.random.normal(ky3, (2, 64), dtype=jnp.bfloat16)
    loss_t = jax.block_until_ready(jax.jit(l2_loss)(xt, yt))
    ref_t = jnp.mean((xt - yt.astype(xt.dtype).reshape(xt.shape)) ** 2)
    assert jnp.allclose(loss_t, ref_t, rtol=1e-5, atol=1e-6), (loss_t, ref_t)

    print("KERNEL_OK")
</pallas_src>

<mosaic_0001>
module attributes {stable_mosaic.version = 11 : i64} {
  func.func @kernel(%arg0: i32, %arg1: i32, %arg2: memref<256x128xf32, #tpu.memory_space<vmem>>, %arg3: memref<256x128xbf16, #tpu.memory_space<vmem>>, %arg4: memref<8x128xf32, #tpu.memory_space<vmem>>, %arg5: memref<64x128xf32, #tpu.memory_space<vmem>>) attributes {dimension_semantics = [#tpu.dimension_semantics<parallel>, #tpu.dimension_semantics<arbitrary>], iteration_bounds = array<i64: 1, 1>, scalar_prefetch = 0 : i64, scratch_operands = 1 : i64, tpu.core_type = #tpu.core_type<tc>, window_params = [{transform_indices = @transform_0, window_bounds = array<i64: 256, 128>}, {transform_indices = @transform_1, window_bounds = array<i64: 256, 128>}, {transform_indices = @transform_2, window_bounds = array<i64: 8, 128>}]} {
    %c1_i32 = arith.constant 1 : i32
    %0 = arith.muli %arg0, %c1_i32 : i32
    %1 = arith.addi %0, %arg1 : i32
    %c256_i32 = arith.constant 256 : i32
    %2 = arith.muli %1, %c256_i32 : i32
    %c0_i32 = arith.constant 0 : i32
    %3 = arith.cmpi eq, %arg1, %c0_i32 : i32
    %4 = arith.extui %3 : i1 to i32
    %c0_i32_0 = arith.constant 0 : i32
    %5 = arith.cmpi ne, %4, %c0_i32_0 : i32
    scf.if %5 {
      %cst_9 = arith.constant 0.000000e+00 : f32
      %18 = vector.broadcast %cst_9 : f32 to vector<64x128xf32>
      %c0 = arith.constant 0 : index
      %c0_10 = arith.constant 0 : index
      %19 = vector.load %arg5[%c0, %c0_10] : memref<64x128xf32, #tpu.memory_space<vmem>>, vector<64x128xf32>
      tpu.vector_store %arg5[%c0, %c0_10], %18 {strides = array<i32>} : memref<64x128xf32, #tpu.memory_space<vmem>>, vector<64x128xf32>,
    } else {
    }
    %cst = arith.constant 0.000000e+00 : f32
    %6 = vector.broadcast %cst : f32 to vector<64x128xf32>
    %c256_i32_1 = arith.constant 256 : i32
    %7 = arith.addi %2, %c256_i32_1 : i32
    %c256_i32_2 = arith.constant 256 : i32
    %8 = arith.cmpi sle, %7, %c256_i32_2 : i32
    %9 = arith.extui %8 : i1 to i32
    %c0_i32_3 = arith.constant 0 : i32
    %10 = arith.cmpi ne, %9, %c0_i32_3 : i32
    scf.if %10 {
      %c0_i32_9 = arith.constant 0 : i32
      %c64_i32 = arith.constant 64 : i32
      %18 = arith.muli %c0_i32_9, %c64_i32 : i32
      %19 = tpu.assume_multiple %18, 64 : i32
      %20 = arith.index_cast %19 : i32 to index
      %c0 = arith.constant 0 : index
      %21 = vector.load %arg2[%20, %c0] : memref<256x128xf32, #tpu.memory_space<vmem>>, vector<64x128xf32>
      %22 = arith.index_cast %19 : i32 to index
      %c0_10 = arith.constant 0 : index
      %23 = vector.load %arg3[%22, %c0_10] : memref<256x128xbf16, #tpu.memory_space<vmem>>, vector<64x128xbf16>
      %24 = arith.extf %23 : vector<64x128xbf16> to vector<64x128xf32>
      %25 = arith.subf %21, %24 : vector<64x128xf32>
      %26 = arith.mulf %25, %25 : vector<64x128xf32>
      %27 = arith.addf %6, %26 : vector<64x128xf32>
      %c1_i32_11 = arith.constant 1 : i32
      %c64_i32_12 = arith.constant 64 : i32
      %28 = arith.muli %c1_i32_11, %c64_i32_12 : i32
      %29 = tpu.assume_multiple %28, 64 : i32
      %30 = arith.index_cast %29 : i32 to index
      %c0_13 = arith.constant 0 : index
      %31 = vector.load %arg2[%30, %c0_13] : memref<256x128xf32, #tpu.memory_space<vmem>>, vector<64x128xf32>
      %32 = arith.index_cast %29 : i32 to index
      %c0_14 = arith.constant 0 : index
      %33 = vector.load %arg3[%32, %c0_14] : memref<256x128xbf16, #tpu.memory_space<vmem>>, vector<64x128xbf16>
      %34 = arith.extf %33 : vector<64x128xbf16> to vector<64x128xf32>
      %35 = arith.subf %31, %34 : vector<64x128xf32>
      %36 = arith.mulf %35, %35 : vector<64x128xf32>
      %37 = arith.addf %27, %36 : vector<64x128xf32>
      %c2_i32 = arith.constant 2 : i32
      %c64_i32_15 = arith.constant 64 : i32
      %38 = arith.muli %c2_i32, %c64_i32_15 : i32
      %39 = tpu.assume_multiple %38, 64 : i32
      %40 = arith.index_cast %39 : i32 to index
      %c0_16 = arith.constant 0 : index
      %41 = vector.load %arg2[%40, %c0_16] : memref<256x128xf32, #tpu.memory_space<vmem>>, vector<64x128xf32>
      %42 = arith.index_cast %39 : i32 to index
      %c0_17 = arith.constant 0 : index
      %43 = vector.load %arg3[%42, %c0_17] : memref<256x128xbf16, #tpu.memory_space<vmem>>, vector<64x128xbf16>
      %44 = arith.extf %43 : vector<64x128xbf16> to vector<64x128xf32>
      %45 = arith.subf %41, %44 : vector<64x128xf32>
      %46 = arith.mulf %45, %45 : vector<64x128xf32>
      %47 = arith.addf %37, %46 : vector<64x128xf32>
      %c3_i32 = arith.constant 3 : i32
      %c64_i32_18 = arith.constant 64 : i32
      %48 = arith.muli %c3_i32, %c64_i32_18 : i32
      %49 = tpu.assume_multiple %48, 64 : i32
      %50 = arith.index_cast %49 : i32 to index
      %c0_19 = arith.constant 0 : index
      %51 = vector.load %arg2[%50, %c0_19] : memref<256x128xf32, #tpu.memory_space<vmem>>, vector<64x128xf32>
      %52 = arith.index_cast %49 : i32 to index
      %c0_20 = arith.constant 0 : index
      %53 = vector.load %arg3[%52, %c0_20] : memref<256x128xbf16, #tpu.memory_space<vmem>>, vector<64x128xbf16>
      %54 = arith.extf %53 : vector<64x128xbf16> to vector<64x128xf32>
      %55 = arith.subf %51, %54 : vector<64x128xf32>
      %56 = arith.mulf %55, %55 : vector<64x128xf32>
      %57 = arith.addf %47, %56 : vector<64x128xf32>
      %c4_i32 = arith.constant 4 : i32
      %c0_21 = arith.constant 0 : index
      %c0_22 = arith.constant 0 : index
      %58 = vector.load %arg5[%c0_21, %c0_22] : memref<64x128xf32, #tpu.memory_space<vmem>>, vector<64x128xf32>
      %59 = arith.addf %58, %57 : vector<64x128xf32>
      %c0_23 = arith.constant 0 : index
      %c0_24 = arith.constant 0 : index
      %60 = vector.load %arg5[%c0_23, %c0_24] : memref<64x128xf32, #tpu.memory_space<vmem>>, vector<64x128xf32>
      tpu.vector_store %arg5[%c0_23, %c0_24], %59 {strides = array<i32>} : memref<64x128xf32, #tpu.memory_space<vmem>>, vector<64x128xf32>,
    } else {
    }
    %c256_i32_4 = arith.constant 256 : i32
    %11 = arith.addi %2, %c256_i32_4 : i32
    %c256_i32_5 = arith.constant 256 : i32
    %12 = arith.cmpi sgt, %11, %c256_i32_5 : i32
    %13 = arith.extui %12 : i1 to i32
    %c0_i32_6 = arith.constant 0 : i32
    %14 = arith.cmpi ne, %13, %c0_i32_6 : i32
    scf.if %14 {
      %18 = tpu.iota {dimensions = array<i32: 0>} : vector<64x128xi32>
      %c0_i32_9 = arith.constant 0 : i32
      %c64_i32 = arith.constant 64 : i32
      %19 = arith.muli %c0_i32_9, %c64_i32 : i32
      %20 = tpu.assume_multiple %19, 64 : i32
      %21 = arith.index_cast %20 : i32 to index
      %c0 = arith.constant 0 : index
      %22 = vector.load %arg2[%21, %c0] : memref<256x128xf32, #tpu.memory_space<vmem>>, vector<64x128xf32>
      %23 = arith.index_cast %20 : i32 to index
      %c0_10 = arith.constant 0 : index
      %24 = vector.load %arg3[%23, %c0_10] : memref<256x128xbf16, #tpu.memory_space<vmem>>, vector<64x128xbf16>
      %25 = arith.extf %24 : vector<64x128xbf16> to vector<64x128xf32>
      %26 = arith.subf %22, %25 : vector<64x128xf32>
      %27 = arith.mulf %26, %26 : vector<64x128xf32>
      %28 = arith.addi %2, %20 : i32
      %29 = vector.broadcast %28 : i32 to vector<64x128xi32>
      %30 = arith.addi %18, %29 : vector<64x128xi32>
      %c256_i32_11 = arith.constant 256 : i32
      %31 = vector.broadcast %c256_i32_11 : i32 to vector<64x128xi32>
      %32 = arith.cmpi slt, %30, %31 : vector<64x128xi32>
      %cst_12 = arith.constant 0.000000e+00 : f32
      %33 = vector.broadcast %cst_12 : f32 to vector<64x128xf32>
      %34 = arith.select %32, %27, %33 : vector<64x128xi1>, vector<64x128xf32>
      %35 = arith.addf %6, %34 : vector<64x128xf32>
      %c1_i32_13 = arith.constant 1 : i32
      %c64_i32_14 = arith.constant 64 : i32
      %36 = arith.muli %c1_i32_13, %c64_i32_14 : i32
      %37 = tpu.assume_multiple %36, 64 : i32
      %38 = arith.index_cast %37 : i32 to index
      %c0_15 = arith.constant 0 : index
      %39 = vector.load %arg2[%38, %c0_15] : memref<256x128xf32, #tpu.memory_space<vmem>>, vector<64x128xf32>
      %40 = arith.index_cast %37 : i32 to index
      %c0_16 = arith.constant 0 : index
      %41 = vector.load %arg3[%40, %c0_16] : memref<256x128xbf16, #tpu.memory_space<vmem>>, vector<64x128xbf16>
      %42 = arith.extf %41 : vector<64x128xbf16> to vector<64x128xf32>
      %43 = arith.subf %39, %42 : vector<64x128xf32>
      %44 = arith.mulf %43, %43 : vector<64x128xf32>
      %45 = arith.addi %2, %37 : i32
      %46 = vector.broadcast %45 : i32 to vector<64x128xi32>
      %47 = arith.addi %18, %46 : vector<64x128xi32>
      %c256_i32_17 = arith.constant 256 : i32
      %48 = vector.broadcast %c256_i32_17 : i32 to vector<64x128xi32>
      %49 = arith.cmpi slt, %47, %48 : vector<64x128xi32>
      %cst_18 = arith.constant 0.000000e+00 : f32
      %50 = vector.broadcast %cst_18 : f32 to vector<64x128xf32>
      %51 = arith.select %49, %44, %50 : vector<64x128xi1>, vector<64x128xf32>
      %52 = arith.addf %35, %51 : vector<64x128xf32>
      %c2_i32 = arith.constant 2 : i32
      %c64_i32_19 = arith.constant 64 : i32
      %53 = arith.muli %c2_i32, %c64_i32_19 : i32
      %54 = tpu.assume_multiple %53, 64 : i32
      %55 = arith.index_cast %54 : i32 to index
      %c0_20 = arith.constant 0 : index
      %56 = vector.load %arg2[%55, %c0_20] : memref<256x128xf32, #tpu.memory_space<vmem>>, vector<64x128xf32>
      %57 = arith.index_cast %54 : i32 to index
      %c0_21 = arith.constant 0 : index
      %58 = vector.load %arg3[%57, %c0_21] : memref<256x128xbf16, #tpu.memory_space<vmem>>, vector<64x128xbf16>
      %59 = arith.extf %58 : vector<64x128xbf16> to vector<64x128xf32>
      %60 = arith.subf %56, %59 : vector<64x128xf32>
      %61 = arith.mulf %60, %60 : vector<64x128xf32>
      %62 = arith.addi %2, %54 : i32
      %63 = vector.broadcast %62 : i32 to vector<64x128xi32>
      %64 = arith.addi %18, %63 : vector<64x128xi32>
      %c256_i32_22 = arith.constant 256 : i32
      %65 = vector.broadcast %c256_i32_22 : i32 to vector<64x128xi32>
      %66 = arith.cmpi slt, %64, %65 : vector<64x128xi32>
      %cst_23 = arith.constant 0.000000e+00 : f32
      %67 = vector.broadcast %cst_23 : f32 to vector<64x128xf32>
      %68 = arith.select %66, %61, %67 : vector<64x128xi1>, vector<64x128xf32>
      %69 = arith.addf %52, %68 : vector<64x128xf32>
      %c3_i32 = arith.constant 3 : i32
      %c64_i32_24 = arith.constant 64 : i32
      %70 = arith.muli %c3_i32, %c64_i32_24 : i32
      %71 = tpu.assume_multiple %70, 64 : i32
      %72 = arith.index_cast %71 : i32 to index
      %c0_25 = arith.constant 0 : index
      %73 = vector.load %arg2[%72, %c0_25] : memref<256x128xf32, #tpu.memory_space<vmem>>, vector<64x128xf32>
      %74 = arith.index_cast %71 : i32 to index
      %c0_26 = arith.constant 0 : index
      %75 = vector.load %arg3[%74, %c0_26] : memref<256x128xbf16, #tpu.memory_space<vmem>>, vector<64x128xbf16>
      %76 = arith.extf %75 : vector<64x128xbf16> to vector<64x128xf32>
      %77 = arith.subf %73, %76 : vector<64x128xf32>
      %78 = arith.mulf %77, %77 : vector<64x128xf32>
      %79 = arith.addi %2, %71 : i32
      %80 = vector.broadcast %79 : i32 to vector<64x128xi32>
      %81 = arith.addi %18, %80 : vector<64x128xi32>
      %c256_i32_27 = arith.constant 256 : i32
      %82 = vector.broadcast %c256_i32_27 : i32 to vector<64x128xi32>
      %83 = arith.cmpi slt, %81, %82 : vector<64x128xi32>
      %cst_28 = arith.constant 0.000000e+00 : f32
      %84 = vector.broadcast %cst_28 : f32 to vector<64x128xf32>
      %85 = arith.select %83, %78, %84 : vector<64x128xi1>, vector<64x128xf32>
      %86 = arith.addf %69, %85 : vector<64x128xf32>
      %c4_i32 = arith.constant 4 : i32
      %c0_29 = arith.constant 0 : index
      %c0_30 = arith.constant 0 : index
      %87 = vector.load %arg5[%c0_29, %c0_30] : memref<64x128xf32, #tpu.memory_space<vmem>>, vector<64x128xf32>
      %88 = arith.addf %87, %86 : vector<64x128xf32>
      %c0_31 = arith.constant 0 : index
      %c0_32 = arith.constant 0 : index
      %89 = vector.load %arg5[%c0_31, %c0_32] : memref<64x128xf32, #tpu.memory_space<vmem>>, vector<64x128xf32>
      tpu.vector_store %arg5[%c0_31, %c0_32], %88 {strides = array<i32>} : memref<64x128xf32, #tpu.memory_space<vmem>>, vector<64x128xf32>,
    } else {
    }
    %c0_i32_7 = arith.constant 0 : i32
    %15 = arith.cmpi eq, %arg1, %c0_i32_7 : i32
    %16 = arith.extui %15 : i1 to i32
    %c0_i32_8 = arith.constant 0 : i32
    %17 = arith.cmpi ne, %16, %c0_i32_8 : i32
    scf.if %17 {
      %c0 = arith.constant 0 : index
      %c0_9 = arith.constant 0 : index
      %18 = vector.load %arg5[%c0, %c0_9] : memref<64x128xf32, #tpu.memory_space<vmem>>, vector<8x128xf32>
      %c8 = arith.constant 8 : index
      %c0_10 = arith.constant 0 : index
      %19 = vector.load %arg5[%c8, %c0_10] : memref<64x128xf32, #tpu.memory_space<vmem>>, vector<8x128xf32>
      %20 = arith.addf %18, %19 : vector<8x128xf32>
      %c16 = arith.constant 16 : index
      %c0_11 = arith.constant 0 : index
      %21 = vector.load %arg5[%c16, %c0_11] : memref<64x128xf32, #tpu.memory_space<vmem>>, vector<8x128xf32>
      %22 = arith.addf %20, %21 : vector<8x128xf32>
      %c24 = arith.constant 24 : index
      %c0_12 = arith.constant 0 : index
      %23 = vector.load %arg5[%c24, %c0_12] : memref<64x128xf32, #tpu.memory_space<vmem>>, vector<8x128xf32>
      %24 = arith.addf %22, %23 : vector<8x128xf32>
      %c32 = arith.constant 32 : index
      %c0_13 = arith.constant 0 : index
      %25 = vector.load %arg5[%c32, %c0_13] : memref<64x128xf32, #tpu.memory_space<vmem>>, vector<8x128xf32>
      %26 = arith.addf %24, %25 : vector<8x128xf32>
      %c40 = arith.constant 40 : index
      %c0_14 = arith.constant 0 : index
      %27 = vector.load %arg5[%c40, %c0_14] : memref<64x128xf32, #tpu.memory_space<vmem>>, vector<8x128xf32>
      %28 = arith.addf %26, %27 : vector<8x128xf32>
      %c48 = arith.constant 48 : index
      %c0_15 = arith.constant 0 : index
      %29 = vector.load %arg5[%c48, %c0_15] : memref<64x128xf32, #tpu.memory_space<vmem>>, vector<8x128xf32>
      %30 = arith.addf %28, %29 : vector<8x128xf32>
      %c56 = arith.constant 56 : index
      %c0_16 = arith.constant 0 : index
      %31 = vector.load %arg5[%c56, %c0_16] : memref<64x128xf32, #tpu.memory_space<vmem>>, vector<8x128xf32>
      %32 = arith.addf %30, %31 : vector<8x128xf32>
      %c0_17 = arith.constant 0 : index
      %c0_18 = arith.constant 0 : index
      %33 = vector.load %arg4[%c0_17, %c0_18] : memref<8x128xf32, #tpu.memory_space<vmem>>, vector<8x128xf32>
      tpu.vector_store %arg4[%c0_17, %c0_18], %32 {strides = array<i32>} : memref<8x128xf32, #tpu.memory_space<vmem>>, vector<8x128xf32>,
    } else {
    }
    return
  }
  func.func @transform_0(%arg0: i32, %arg1: i32) -> (i32, i32) {
    %c1_i32 = arith.constant 1 : i32
    %0 = arith.muli %arg0, %c1_i32 : i32
    %1 = arith.addi %0, %arg1 : i32
    %c0_i32 = arith.constant 0 : i32
    %2 = arith.minsi %1, %c0_i32 : i32
    %c0_i32_0 = arith.constant 0 : i32
    %c0_i32_1 = arith.constant 0 : i32
    return %2, %c0_i32_0 : i32, i32
  }
  func.func @transform_1(%arg0: i32, %arg1: i32) -> (i32, i32) {
    %c1_i32 = arith.constant 1 : i32
    %0 = arith.muli %arg0, %c1_i32 : i32
    %1 = arith.addi %0, %arg1 : i32
    %c0_i32 = arith.constant 0 : i32
    %2 = arith.minsi %1, %c0_i32 : i32
    %c0_i32_0 = arith.constant 0 : i32
    %c0_i32_1 = arith.constant 0 : i32
    return %2, %c0_i32_0 : i32, i32
  }
  func.func @transform_2(%arg0: i32, %arg1: i32) -> (i32, i32) {
    %c0_i32 = arith.constant 0 : i32
    %c0_i32_0 = arith.constant 0 : i32
    return %arg0, %c0_i32 : i32, i32
  }
}

</mosaic_0001>

<bundles_post_ra>
// kernel: l2_loss.1
= control target key start
LH: loop header
LB: loop body
LE: loop exit
PB: predicated region body
PF: predicated region fallthrough
CT: control target
= control target key end

     0   :  { %s1030_s1 = inlined_call_operand.vmem [shape: bf16[256,128], index: 1, kind: input, shape index: {}]   ;;  %s1031_s0 = inlined_call_operand.vmem [shape: f32[256,128], index: 0, kind: input, shape index: {}]   ;;  %s1032_s2 = inlined_call_operand.vmem [shape: f32[8,128], index: 2, kind: output, shape index: {}]  }
   0x1   :  { %v787_v0 = vld [vmem:[%s1030_s1] sm:$0xff]   ;;  %v850_v2 = vld [vmem:[%s1030_s1 + $0x8] sm:$0xff]   ;;  %v851_v3 = vld [vmem:[%s1030_s1 + $0x10] sm:$0xff]  }
   0x2   :  { %v788_v1 = vunpack.c.l.bf16 %v787_v0  ;;  %v852_v4 = vld [vmem:[%s1030_s1 + $0x18] sm:$0xff]   ;;  %v94_v5 = vld [vmem:[%s1031_s0] sm:$0xff]  ;;  %v95_v6 = vld [vmem:[%s1031_s0 + $0x8] sm:$0xff]  ;;  %v789_v7 = vunpack.c.h.bf16 %v787_v0  ;;  %v792_v8 = vunpack.c.l.bf16 %v850_v2  ;;  %v793_v9 = vunpack.c.h.bf16 %v850_v2 }
   0x3   :  { %v796_v10 = vunpack.c.l.bf16 %v851_v3  ;;  %v96_v11 = vld [vmem:[%s1031_s0 + $0x10] sm:$0xff]  ;;  %v97_v12 = vld [vmem:[%s1031_s0 + $0x18] sm:$0xff]  ;;  %v98_v13 = vld [vmem:[%s1031_s0 + $0x20] sm:$0xff]  ;;  %v797_v14 = vunpack.c.h.bf16 %v851_v3  ;;  %v800_v15 = vunpack.c.l.bf16 %v852_v4  ;;  %v801_v20 = vunpack.c.h.bf16 %v852_v4 }
   0x4   :  { %v99_v16 = vld [vmem:[%s1031_s0 + $0x28] sm:$0xff]  ;;  %v100_v17 = vld [vmem:[%s1031_s0 + $0x30] sm:$0xff]  ;;  %v853_v18 = vld [vmem:[%s1030_s1 + $0x20] sm:$0xff]   ;;  %v118_v21 = vsub.f32 %v94_v5, %v788_v1  ;;  %v119_v24 = vsub.f32 %v95_v6, %v789_v7  ;;  %v120_v25 = vsub.f32 %v96_v11, %v792_v8  ;;  %v121_v26 = vsub.f32 %v97_v12, %v793_v9 }
   0x5   :  { %v101_v19 = vld [vmem:[%s1031_s0 + $0x38] sm:$0xff]  ;;  %v854_v22 = vld [vmem:[%s1030_s1 + $0x28] sm:$0xff]   ;;  %v855_v23 = vld [vmem:[%s1030_s1 + $0x30] sm:$0xff]   ;;  %v122_v27 = vsub.f32 %v98_v13, %v796_v10  ;;  %v123_v31 = vsub.f32 %v99_v16, %v797_v14  ;;  %v124_v32 = vsub.f32 %v100_v17, %v800_v15  ;;  %v804_v36 = vunpack.c.l.bf16 %v853_v18 }
   0x6   :  { %v690_v28 = vld [vmem:[%s1031_s0 + $0x40] sm:$0xff]  ;;  %v691_v29 = vld [vmem:[%s1031_s0 + $0x48] sm:$0xff]  ;;  %v856_v30 = vld [vmem:[%s1030_s1 + $0x38] sm:$0xff]   ;;  %v805_v37 = vunpack.c.h.bf16 %v853_v18  ;;  %v808_v40 = vunpack.c.l.bf16 %v854_v22  ;;  %v809_v41 = vunpack.c.h.bf16 %v854_v22  ;;  %v812_v42 = vunpack.c.l.bf16 %v855_v23 }
   0x7   :  { %v692_v33 = vld [vmem:[%s1031_s0 + $0x50] sm:$0xff]  ;;  %v693_v34 = vld [vmem:[%s1031_s0 + $0x58] sm:$0xff]  ;;  %v694_v35 = vld [vmem:[%s1031_s0 + $0x60] sm:$0xff]  ;;  %v813_v43 = vunpack.c.h.bf16 %v855_v23  ;;  %v125_v44 = vsub.f32 %v101_v19, %v801_v20  ;;  %v816_v45 = vunpack.c.l.bf16 %v856_v30  ;;  %v817_v46 = vunpack.c.h.bf16 %v856_v30 }
   0x8   :  { %v695_v38 = vld [vmem:[%s1031_s0 + $0x68] sm:$0xff]  ;;  %v696_v39 = vld [vmem:[%s1031_s0 + $0x70] sm:$0xff]  ;;  %v168_v47 = vsub.f32 %v690_v28, %v804_v36  ;;  %v697_v48 = vld [vmem:[%s1031_s0 + $0x78] sm:$0xff]  ;;  %v169_v49 = vsub.f32 %v691_v29, %v805_v37  ;;  %v170_v50 = vsub.f32 %v692_v33, %v808_v40  ;;  %v171_v51 = vsub.f32 %v693_v34, %v809_v41 }
   0x9   :  { %v172_v52 = vsub.f32 %v694_v35, %v812_v42  ;;  %v126_v53 = vmul.f32 %v118_v21, %v118_v21  ;;  %v127_v54 = vmul.f32 %v119_v24, %v119_v24  ;;  %v173_v55 = vsub.f32 %v695_v38, %v813_v43  ;;  %v857_v61 = vld [vmem:[%s1030_s1 + $0x40] sm:$0xff]   ;;  %v858_v3 = vld [vmem:[%s1030_s1 + $0x48] sm:$0xff]   ;;  %v859_v4 = vld [vmem:[%s1030_s1 + $0x50] sm:$0xff]  }
   0xa   :  { %v174_v56 = vsub.f32 %v696_v39, %v816_v45  ;;  %v128_v57 = vmul.f32 %v120_v25, %v120_v25  ;;  %v129_v58 = vmul.f32 %v121_v26, %v121_v26  ;;  %v130_v59 = vmul.f32 %v122_v27, %v122_v27  ;;  %v706_v2 = vld [vmem:[%s1031_s0 + $0x80] sm:$0xff]  ;;  %v707_v9 = vld [vmem:[%s1031_s0 + $0x88] sm:$0xff]  ;;  %v708_v10 = vld [vmem:[%s1031_s0 + $0x90] sm:$0xff] }
   0xb   :  { %v131_v60 = vmul.f32 %v123_v31, %v123_v31  ;;  %v132_v62 = vmul.f32 %v124_v32, %v124_v32  ;;  %v955_v63 = vmul.f32 %v125_v44, %v125_v44  ;;  %v175_v0 = vsub.f32 %v697_v48, %v817_v46  ;;  %v860_v11 = vld [vmem:[%s1030_s1 + $0x58] sm:$0xff]   ;;  %v710_v15 = vld [vmem:[%s1031_s0 + $0xa0] sm:$0xff]  ;;  %v711_v16 = vld [vmem:[%s1031_s0 + $0xa8] sm:$0xff] }
   0xc   :  { %v176_v1 = vmul.f32 %v168_v47, %v168_v47  ;;  %v177_v5 = vmul.f32 %v169_v49, %v169_v49  ;;  %v178_v6 = vmul.f32 %v170_v50, %v170_v50  ;;  %v179_v7 = vmul.f32 %v171_v51, %v171_v51  ;;  %v709_v14 = vld [vmem:[%s1031_s0 + $0x98] sm:$0xff]  ;;  %v712_v27 = vld [vmem:[%s1031_s0 + $0xb0] sm:$0xff]  ;;  %v861_v41 = vld [vmem:[%s1030_s1 + $0x60] sm:$0xff]  }
   0xd   :  { %v180_v8 = vmul.f32 %v172_v52, %v172_v52  ;;  %v181_v12 = vmul.f32 %v173_v55, %v173_v55  ;;  %v182_v13 = vmul.f32 %v174_v56, %v174_v56  ;;  %v820_v17 = vunpack.c.l.bf16 %v857_v61  ;;  %v713_v34 = vld [vmem:[%s1031_s0 + $0xb8] sm:$0xff]  ;;  %v862_v46 = vld [vmem:[%s1030_s1 + $0x68] sm:$0xff]   ;;  %v863_v47 = vld [vmem:[%s1030_s1 + $0x70] sm:$0xff]  }
   0xe   :  { %v821_v18 = vunpack.c.h.bf16 %v857_v61  ;;  %v824_v19 = vunpack.c.l.bf16 %v858_v3  ;;  %v825_v20 = vunpack.c.h.bf16 %v858_v3  ;;  %v828_v21 = vunpack.c.l.bf16 %v859_v4  ;;  %v722_v52 = vld [vmem:[%s1031_s0 + $0xc0] sm:$0xff] }
   0xf   :  { %v829_v22 = vunpack.c.h.bf16 %v859_v4  ;;  %v832_v23 = vunpack.c.l.bf16 %v860_v11  ;;  %v833_v24 = vunpack.c.h.bf16 %v860_v11  ;;  %v218_v25 = vsub.f32 %v706_v2, %v820_v17 }
  0x10   :  { %v219_v26 = vsub.f32 %v707_v9, %v821_v18  ;;  %v220_v28 = vsub.f32 %v708_v10, %v824_v19  ;;  %v221_v29 = vsub.f32 %v709_v14, %v825_v20  ;;  %v222_v30 = vsub.f32 %v710_v15, %v828_v21  ;;  %v728_v9 = vld [vmem:[%s1031_s0 + $0xf0] sm:$0xff]  ;;  %v729_v19 = vld [vmem:[%s1031_s0 + $0xf8] sm:$0xff] }
  0x11   :  { %v223_v31 = vsub.f32 %v711_v16, %v829_v22  ;;  %v184_v32 = vadd.f32 %v176_v1, %v126_v53  ;;  %v185_v33 = vadd.f32 %v177_v5, %v127_v54  ;;  %v226_v35 = vmul.f32 %v218_v25, %v218_v25  ;;  %v723_v53 = vld [vmem:[%s1031_s0 + $0xc8] sm:$0xff]  ;;  %v864_v54 = vld [vmem:[%s1030_s1 + $0x78] sm:$0xff]  }
  0x12   :  { %v227_v36 = vmul.f32 %v219_v26, %v219_v26  ;;  %v183_v37 = vmul.f32 %v175_v0, %v175_v0  ;;  %v186_v38 = vadd.f32 %v178_v6, %v128_v57  ;;  %v187_v39 = vadd.f32 %v179_v7, %v129_v58  ;;  %v724_v57 = vld [vmem:[%s1031_s0 + $0xd0] sm:$0xff]  ;;  %v725_v58 = vld [vmem:[%s1031_s0 + $0xd8] sm:$0xff] }
  0x13   :  { %v188_v40 = vadd.f32 %v180_v8, %v130_v59  ;;  %v189_v42 = vadd.f32 %v181_v12, %v131_v60  ;;  %v190_v43 = vadd.f32 %v182_v13, %v132_v62  ;;  %v224_v44 = vsub.f32 %v712_v27, %v832_v23  ;;  %v726_v59 = vld [vmem:[%s1031_s0 + $0xe0] sm:$0xff]  ;;  %v727_v62 = vld [vmem:[%s1031_s0 + $0xe8] sm:$0xff] }
  0x14   :  { %v228_v45 = vmul.f32 %v220_v28, %v220_v28  ;;  %v225_v48 = vsub.f32 %v713_v34, %v833_v24  ;;  %v229_v49 = vmul.f32 %v221_v29, %v221_v29  ;;  %v230_v50 = vmul.f32 %v222_v30, %v222_v30 }
  0x15   :  { %v231_v51 = vmul.f32 %v223_v31, %v223_v31  ;;  %v234_v55 = vadd.f32 %v226_v35, %v184_v32  ;;  %v235_v56 = vadd.f32 %v227_v36, %v185_v33  ;;  %v836_v60 = vunpack.c.l.bf16 %v861_v41 }
  0x16   :  { %v837_v61 = vunpack.c.h.bf16 %v861_v41  ;;  %v840_v0 = vunpack.c.l.bf16 %v862_v46  ;;  %v841_v1 = vunpack.c.h.bf16 %v862_v46  ;;  %v844_v2 = vunpack.c.l.bf16 %v863_v47 }
  0x17   :  { %v845_v3 = vunpack.c.h.bf16 %v863_v47  ;;  %v236_v4 = vadd.f32 %v228_v45, %v186_v38  ;;  %v848_v5 = vunpack.c.l.bf16 %v864_v54  ;;  %v268_v6 = vsub.f32 %v722_v52, %v836_v60 }
  0x18   :  { %v269_v7 = vsub.f32 %v723_v53, %v837_v61  ;;  %v237_v8 = vadd.f32 %v229_v49, %v187_v39  ;;  %v270_v10 = vsub.f32 %v724_v57, %v840_v0  ;;  %v271_v11 = vsub.f32 %v725_v58, %v841_v1 }
  0x19   :  { %v272_v12 = vsub.f32 %v726_v59, %v844_v2  ;;  %v849_v13 = vunpack.c.h.bf16 %v864_v54  ;;  %v273_v14 = vsub.f32 %v727_v62, %v845_v3  ;;  %v276_v15 = vmul.f32 %v268_v6, %v268_v6 }
  0x1a   :  { %v277_v16 = vmul.f32 %v269_v7, %v269_v7  ;;  %v232_v17 = vmul.f32 %v224_v44, %v224_v44  ;;  %v238_v18 = vadd.f32 %v230_v50, %v188_v40  ;;  %v278_v20 = vmul.f32 %v270_v10, %v270_v10 }
  0x1b   :  { %v279_v21 = vmul.f32 %v271_v11, %v271_v11  ;;  %v274_v22 = vsub.f32 %v728_v9, %v848_v5  ;;  %v280_v23 = vmul.f32 %v272_v12, %v272_v12  ;;  %v284_v24 = vadd.f32 %v276_v15, %v234_v55 }
  0x1c   :  { %v285_v25 = vadd.f32 %v277_v16, %v235_v56  ;;  %v191_v26 = vadd.f32 %v183_v37, %v955_v63  ;;  %v233_v27 = vmul.f32 %v225_v48, %v225_v48  ;;  %v239_v28 = vadd.f32 %v231_v51, %v189_v42 }
  0x1d   :  { %v286_v29 = vadd.f32 %v278_v20, %v236_v4  ;;  %v275_v30 = vsub.f32 %v729_v19, %v849_v13  ;;  %v281_v31 = vmul.f32 %v273_v14, %v273_v14  ;;  %v287_v32 = vadd.f32 %v279_v21, %v237_v8 }
  0x1e   :  { %v660_v33 = vadd.f32 %v285_v25, %v284_v24  ;;  %v240_v34 = vadd.f32 %v232_v17, %v190_v43  ;;  %v282_v35 = vmul.f32 %v274_v22, %v274_v22  ;;  %v288_v36 = vadd.f32 %v280_v23, %v238_v18 }
  0x1f   :  { %v241_v39 = vadd.f32 %v233_v27, %v191_v26  ;;  %v283_v40 = vmul.f32 %v275_v30, %v275_v30  ;;  %v289_v41 = vadd.f32 %v281_v31, %v239_v28 }
  0x20   :  { %v662_v38 = vadd.f32 %v660_v33, %v286_v29  ;;  %v290_v45 = vadd.f32 %v282_v35, %v240_v34 }
  0x21   :  { %v291_v47 = vadd.f32 %v283_v40, %v241_v39 }
  0x22   :  { %v664_v44 = vadd.f32 %v662_v38, %v287_v32 }
  0x24   :  { %v666_v46 = vadd.f32 %v664_v44, %v288_v36 }
  0x26   :  { %v668_v49 = vadd.f32 %v666_v46, %v289_v41 }
  0x28   :  { %v670_v63 = vadd.f32 %v668_v49, %v290_v45 }
  0x2a   :  { %v672_v37 = vadd.f32 %v670_v63, %v291_v47 }
  0x2c   :  { %673 = vst [vmem:[%s1032_s2] sm:$0xff] %v672_v37 }

</bundles_post_ra>
